<compile_context>
chip_gen: v7x
topology: tpu7x:2x2x1
jax: 0.10.0
libtpu: 0.0.40
codegen_flags: <defaults>
</compile_context>

<pallas_src>
import functools

import numpy as np
import jax
import jax.numpy as jnp
from jax import lax
from jax.experimental import pallas as pl
from jax.experimental.pallas import tpu as pltpu


# Set to jnp.bfloat16 on v6e/v7x to run the conv/reduce MXU contractions in
# bf16 (accumulation and the BN/ReLU epilogue stay in f32).
MATMUL_DTYPE = jnp.float32
BN_EPS = 1e-5
VMEM_LIMIT = 32 * 1024 * 1024
_CPARAMS = pltpu.CompilerParams(dimension_semantics=("parallel",),
                                vmem_limit_bytes=VMEM_LIMIT)


# ----------------------------------------------------------------------------
# Host-side (cached) bicubic interpolation matrices, PyTorch semantics
# (align_corners=True, a=-0.75, index clamping at the borders).
# ----------------------------------------------------------------------------
def _cubic_weight(t, a=-0.75):
    t = abs(float(t))
    if t <= 1.0:
        return (a + 2.0) * t ** 3 - (a + 3.0) * t ** 2 + 1.0
    if t < 2.0:
        return a * t ** 3 - 5.0 * a * t ** 2 + 8.0 * a * t - 4.0 * a
    return 0.0


@functools.lru_cache(maxsize=None)
def _bicubic_matrix(n_in, n_out):
    """U such that y = U @ x is PyTorch 1-D bicubic upsample (align_corners)."""
    U = np.zeros((n_out, n_in), np.float32)
    for j in range(n_out):
        src = (j * (n_in - 1) / (n_out - 1)) if n_out > 1 else 0.0
        i0 = int(np.floor(src))
        frac = src - i0
        for k in range(-1, 3):
            w = _cubic_weight(k - frac)
            idx = min(max(i0 + k, 0), n_in - 1)
            U[j, idx] += w
    return U


@functools.lru_cache(maxsize=None)
def _padded_interp_mats(H, W, Ho, Wo, H2, W2):
    """Uh_pad (H2,H), Uw_pad^T (W,W2) and interior mask (1,H2,W2).

    The F.pad([dX//2, dX-dX//2, dY//2, dY-dY//2]) step of Up.forward is folded
    into zero rows of the interpolation matrices (also handles negative pads)."""
    Uh = _bicubic_matrix(H, Ho)
    Uw = _bicubic_matrix(W, Wo)
    py = (H2 - Ho) // 2
    px = (W2 - Wo) // 2
    Uhp = np.zeros((H2, H), np.float32)
    mh = np.zeros((H2,), np.float32)
    for i in range(H2):
        j = i - py
        if 0 <= j < Ho:
            Uhp[i] = Uh[j]
            mh[i] = 1.0
    Uwp = np.zeros((W2, W), np.float32)
    mw = np.zeros((W2,), np.float32)
    for i in range(W2):
        j = i - px
        if 0 <= j < Wo:
            Uwp[i] = Uw[j]
            mw[i] = 1.0
    bmask = np.outer(mh, mw).reshape(1, H2, W2).astype(np.float32)
    return Uhp, np.ascontiguousarray(Uwp.T), bmask


@functools.lru_cache(maxsize=None)
def _edge_masks(H, W):
    """(2, H*W) column-validity masks for the flattened 3x3 taps:
    row 0 kills dx=0 taps at w==0, row 1 kills dx=2 taps at w==W-1."""
    P = H * W
    col = np.arange(P) % W
    m = np.ones((2, P), np.float32)
    m[0, col == 0] = 0.0
    m[1, col == W - 1] = 0.0
    return m


# ----------------------------------------------------------------------------
# Kernel 1: 1x1 "reduce" conv (channel mix), applied BEFORE the upsample.
# Bias is added after the upsample (exactly equivalent, see upsample kernel).
# ----------------------------------------------------------------------------
def reduce1x1_kernel(x_ref, w_ref, o_ref):
    # x_ref: (1, C1, P)   w_ref: (Co, C1)   o_ref: (1, Co, P)
    o_ref[0] = jnp.dot(w_ref[...].astype(MATMUL_DTYPE),
                       x_ref[0].astype(MATMUL_DTYPE),
                       preferred_element_type=jnp.float32)


def reduce1x1(x1_flat, wrt):
    N, C1, P = x1_flat.shape
    Co = wrt.shape[0]
    return pl.pallas_call(
        reduce1x1_kernel,
        out_shape=jax.ShapeDtypeStruct((N, Co, P), jnp.float32),
        grid=(N,),
        in_specs=[pl.BlockSpec((1, C1, P), lambda n: (n, 0, 0)),
                  pl.BlockSpec((Co, C1), lambda n: (0, 0))],
        out_specs=pl.BlockSpec((1, Co, P), lambda n: (n, 0, 0)),
        compiler_params=_CPARAMS,
    )(x1_flat, wrt)


# ----------------------------------------------------------------------------
# Kernel 2: separable bicubic upsample (+ fused F.pad offsets + reduce bias).
# Two channel-batched MXU matmuls; interpolation stays in f32.
# ----------------------------------------------------------------------------
def upsample_kernel(x_ref, uhp_ref, uwpt_ref, bias_ref, bmask_ref, o_ref):
    # x_ref: (1, C, H, W)   uhp: (H2, H)   uwpt: (W, W2)
    # bias_ref: (C, 1, 1)   bmask: (1, H2, W2)   o_ref: (1, C, H2, W2)
    _, C, H, W = x_ref.shape
    H2 = uhp_ref.shape[0]
    W2 = uwpt_ref.shape[1]
    x = x_ref[0]                                                    # (C, H, W)
    # width pass: batched over channels  (C,H,W) x (C,W,W2) -> (C,H,W2)
    uwpt_b = jnp.broadcast_to(uwpt_ref[...][None], (C, W, W2))
    t = lax.dot_general(x, uwpt_b, (((2,), (1,)), ((0,), (0,))),
                        preferred_element_type=jnp.float32)
    # height pass: (C,H2,H) x (C,H,W2) -> (C,H2,W2)
    uhp_b = jnp.broadcast_to(uhp_ref[...][None], (C, H2, H))
    y = lax.dot_general(uhp_b, t, (((2,), (1,)), ((0,), (0,))),
                        preferred_element_type=jnp.float32)
    # reduce-conv bias, only on the non-padded interior
    o_ref[0] = y + bias_ref[...] * bmask_ref[...]


def upsample(xr_nchw, uhp, uwpt, bias, bmask):
    N, C, H, W = xr_nchw.shape
    H2 = uhp.shape[0]
    W2 = uwpt.shape[1]
    return pl.pallas_call(
        upsample_kernel,
        out_shape=jax.ShapeDtypeStruct((N, C, H2, W2), jnp.float32),
        grid=(N,),
        in_specs=[
            pl.BlockSpec((1, C, H, W), lambda n: (n, 0, 0, 0)),
            pl.BlockSpec((H2, H), lambda n: (0, 0)),
            pl.BlockSpec((W, W2), lambda n: (0, 0)),
            pl.BlockSpec((C, 1, 1), lambda n: (0, 0, 0)),
            pl.BlockSpec((1, H2, W2), lambda n: (0, 0, 0)),
        ],
        out_specs=pl.BlockSpec((1, C, H2, W2), lambda n: (n, 0, 0, 0)),
        compiler_params=_CPARAMS,
    )(xr_nchw, uhp, uwpt, bias, bmask)


# ----------------------------------------------------------------------------
# Kernel 3: fused pad + concat + DoubleConv  (conv3x3 -> BN -> ReLU) x 2
# All tensors are (channels, H*W) with the pixel axis on the 128-lane minor
# dim.  3x3 neighbourhoods are gathered as lane-shifted windows of the
# flattened map (zero halo + edge-column masks), then each conv is a single
# im2col matmul.
# ----------------------------------------------------------------------------
def _shifted_taps(x_flat, W, mL, mR):
    """All 9 3x3 taps of a row-major flattened (C, H*W) map -> (9*C, H*W)."""
    C, P = x_flat.shape
    pad = W + 1
    z = jnp.zeros((C, pad), x_flat.dtype)
    xp = jnp.concatenate([z, x_flat, z], axis=1)          # (C, P + 2W + 2)
    taps = []
    for dy in range(3):
        for dx in range(3):
            s = pad + (dy - 1) * W + (dx - 1)             # static offset
            win = xp[:, s:s + P]
            if dx == 0:
                win = win * mL                            # w == 0 invalid
            elif dx == 2:
                win = win * mR                            # w == W-1 invalid
            taps.append(win)
    return jnp.concatenate(taps, axis=0)                  # (9*C, P)


def double_conv_kernel(x2_ref, r_ref, m_ref, w1_ref, s1_ref, b1_ref,
                       w2_ref, s2_ref, b2_ref, o_ref, *, W):
    # x2_ref: (1, C2, P)   r_ref: (1, Cm, P)   m_ref: (2, P)
    # w1_ref: (Co, 9*(C2+Cm))   w2_ref: (Co, 9*Co)   s*/b*: (Co, 1)
    # o_ref : (1, Co, P)
    mL = m_ref[0:1, :]
    mR = m_ref[1:2, :]

    # conv1: concat([x2, r], channel dim) realised via split weights
    p1 = jnp.concatenate([_shifted_taps(x2_ref[0], W, mL, mR),
                          _shifted_taps(r_ref[0], W, mL, mR)], axis=0)
    acc1 = jnp.dot(w1_ref[...].astype(MATMUL_DTYPE), p1.astype(MATMUL_DTYPE),
                   preferred_element_type=jnp.float32)    # (Co, P)
    h = jnp.maximum(acc1 * s1_ref[...] + b1_ref[...], 0.0)

    # conv2 on the in-register intermediate (no scratch round-trip)
    p2 = _shifted_taps(h, W, mL, mR)
    acc2 = jnp.dot(w2_ref[...].astype(MATMUL_DTYPE), p2.astype(MATMUL_DTYPE),
                   preferred_element_type=jnp.float32)
    o_ref[0] = jnp.maximum(acc2 * s2_ref[...] + b2_ref[...], 0.0)


def double_conv(x2_flat, r_flat, masks, w1, s1, b1, w2, s2, b2, W):
    N, C2, P = x2_flat.shape
    Cm = r_flat.shape[1]
    Co = w2.shape[0]
    kern = functools.partial(double_conv_kernel, W=W)
    return pl.pallas_call(
        kern,
        out_shape=jax.ShapeDtypeStruct((N, Co, P), jnp.float32),
        grid=(N,),
        in_specs=[
            pl.BlockSpec((1, C2, P), lambda n: (n, 0, 0)),
            pl.BlockSpec((1, Cm, P), lambda n: (n, 0, 0)),
            pl.BlockSpec((2, P), lambda n: (0, 0)),
            pl.BlockSpec(w1.shape, lambda n: (0, 0)),
            pl.BlockSpec(s1.shape, lambda n: (0, 0)),
            pl.BlockSpec(b1.shape, lambda n: (0, 0)),
            pl.BlockSpec(w2.shape, lambda n: (0, 0)),
            pl.BlockSpec(s2.shape, lambda n: (0, 0)),
            pl.BlockSpec(b2.shape, lambda n: (0, 0)),
        ],
        out_specs=pl.BlockSpec((1, Co, P), lambda n: (n, 0, 0)),
        compiler_params=_CPARAMS,
    )(x2_flat, r_flat, masks, w1, s1, b1, w2, s2, b2)


# ----------------------------------------------------------------------------
# Parameters: synthetic PyTorch-layout params, converted to kernel layouts.
# ----------------------------------------------------------------------------
def init_torch_params(key, c1, c2, co):
    ks = jax.random.split(key, 14)
    p = {"reduce_w": 0.1 * jax.random.normal(ks[0], (co, c1, 1, 1), jnp.float32),
         "reduce_b": 0.1 * jax.random.normal(ks[1], (co,), jnp.float32)}

    def conv_bn(kw, kb, kg, kbe, km, kv, cin, cout):
        return dict(
            w=0.1 * jax.random.normal(kw, (cout, cin, 3, 3), jnp.float32),
            b=0.05 * jax.random.normal(kb, (cout,), jnp.float32),
            gamma=1.0 + 0.1 * jax.random.normal(kg, (cout,), jnp.float32),
            beta=0.05 * jax.random.normal(kbe, (cout,), jnp.float32),
            mean=0.1 * jax.random.normal(km, (cout,), jnp.float32),
            var=0.9 + 0.2 * jax.random.uniform(kv, (cout,), jnp.float32))

    p["conv1"] = conv_bn(*ks[2:8], c2 + co, co)   # cat([x2, r]) -> first C2 = x2
    p["conv2"] = conv_bn(*ks[8:14], co, co)
    return p


def prepare_params(tp, c2):
    co = tp["reduce_w"].shape[0]

    def fold_bn(cb):
        scale = cb["gamma"] / jnp.sqrt(cb["var"] + BN_EPS)
        bias = cb["beta"] + (cb["b"] - cb["mean"]) * scale
        return scale.reshape(co, 1), bias.reshape(co, 1)

    def conv_mat(w):  # (Co, Cin, 3, 3) -> (Co, 9*Cin), col = (dy*3+dx)*Cin + ci
        cout, cin = w.shape[0], w.shape[1]
        return jnp.transpose(w, (0, 2, 3, 1)).reshape(cout, 9 * cin)

    out = {"wrt": tp["reduce_w"].reshape(co, -1),
           "br": tp["reduce_b"].reshape(co, 1, 1)}
    w1 = tp["conv1"]["w"]
    out["w1"] = jnp.concatenate([conv_mat(w1[:, :c2]), conv_mat(w1[:, c2:])], axis=1)
    out["s1"], out["b1"] = fold_bn(tp["conv1"])
    out["w2"] = conv_mat(tp["conv2"]["w"])
    out["s2"], out["b2"] = fold_bn(tp["conv2"])
    return out


# ----------------------------------------------------------------------------
# Up.forward  (all tensors NCHW at this boundary, like PyTorch)
# ----------------------------------------------------------------------------
def up_forward(x1_nchw, x2_nchw, kparams):
    N, C1, H, W = x1_nchw.shape
    _, C2, H2, W2 = x2_nchw.shape
    Ho, Wo = 2 * H, 2 * W
    Co = kparams["wrt"].shape[0]

    uhp, uwpt, bmask = _padded_interp_mats(H, W, Ho, Wo, H2, W2)
    masks = _edge_masks(H2, W2)

    xr = reduce1x1(x1_nchw.reshape(N, C1, H * W), kparams["wrt"])
    r = upsample(xr.reshape(N, Co, H, W), jnp.asarray(uhp), jnp.asarray(uwpt),
                 kparams["br"], jnp.asarray(bmask))
    y = double_conv(x2_nchw.reshape(N, C2, H2 * W2), r.reshape(N, Co, H2 * W2),
                    jnp.asarray(masks),
                    kparams["w1"], kparams["s1"], kparams["b1"],
                    kparams["w2"], kparams["s2"], kparams["b2"], W2)
    return y.reshape(N, Co, H2, W2)


# ----------------------------------------------------------------------------
# Pure-JAX reference (same math, PyTorch layouts) for a runtime self-check.
# ----------------------------------------------------------------------------
def up_forward_reference(x1, x2, tp):
    N, C1, H, W = x1.shape
    _, C2, H2, W2 = x2.shape
    Ho, Wo = 2 * H, 2 * W
    Uh = jnp.asarray(_bicubic_matrix(H, Ho))
    Uw = jnp.asarray(_bicubic_matrix(W, Wo))
    hp = jnp.einsum('ah,nchw->ncaw', Uh, x1, precision=lax.Precision.HIGHEST)
    up = jnp.einsum('bw,ncaw->ncab', Uw, hp, precision=lax.Precision.HIGHEST)
    r = jnp.einsum('oc,ncab->noab', tp["reduce_w"].reshape(-1, C1), up,
                   precision=lax.Precision.HIGHEST)
    r = r + tp["reduce_b"].reshape(1, -1, 1, 1)
    dY, dX = H2 - Ho, W2 - Wo
    r = jnp.pad(r, ((0, 0), (0, 0), (dY // 2, dY - dY // 2),
                    (dX // 2, dX - dX // 2)))
    x = jnp.concatenate([x2, r], axis=1)

    def conv_bn_relu(xin, cb):
        y = lax.conv_general_dilated(xin, cb["w"], (1, 1), 'SAME',
                                     dimension_numbers=('NCHW', 'OIHW', 'NCHW'),
                                     precision=lax.Precision.HIGHEST)
        y = y + cb["b"].reshape(1, -1, 1, 1)
        y = (y - cb["mean"].reshape(1, -1, 1, 1)) / jnp.sqrt(
            cb["var"].reshape(1, -1, 1, 1) + BN_EPS)
        y = y * cb["gamma"].reshape(1, -1, 1, 1) + cb["beta"].reshape(1, -1, 1, 1)
        return jnp.maximum(y, 0.0)

    return conv_bn_relu(conv_bn_relu(x, tp["conv1"]), tp["conv2"])


if __name__ == "__main__":
    key = jax.random.PRNGKey(0)
    kx1, kx2, kp = jax.random.split(key, 3)

    N, C1, C2, Co = 2, 4, 6, 8
    H = W = 8
    x1 = jax.random.normal(kx1, (N, C1, H, W), jnp.float32)           # low-res
    x2 = jax.random.normal(kx2, (N, C2, 2 * H, 2 * W), jnp.float32)   # skip

    tparams = init_torch_params(kp, C1, C2, Co)
    kparams = prepare_params(tparams, C2)

    y = up_forward(x1, x2, kparams)
    y = jax.block_until_ready(y)

    assert y.shape == (N, Co, 2 * H, 2 * W), y.shape
    assert bool(jnp.all(jnp.isfinite(y)))

    y_ref = up_forward_reference(x1, x2, tparams)
    np.testing.assert_allclose(np.asarray(y), np.asarray(y_ref),
                               rtol=2e-3, atol=2e-3)
    print("KERNEL_OK")
</pallas_src>

<mosaic_0001>
module attributes {stable_mosaic.version = 11 : i64} {
  func.func @reduce1x1_kernel(%arg0: i32, %arg1: memref<1x4x64xf32, #tpu.memory_space<vmem>>, %arg2: memref<8x4xf32, #tpu.memory_space<vmem>>, %arg3: memref<1x8x64xf32, #tpu.memory_space<vmem>>) attributes {dimension_semantics = [#tpu.dimension_semantics<parallel>], iteration_bounds = array<i64: 2>, scalar_prefetch = 0 : i64, scratch_operands = 0 : i64, tpu.core_type = #tpu.core_type<tc>, window_params = [{transform_indices = @transform_0, window_bounds = array<i64: 1, 4, 64>}, {pipeline_mode = #tpu.pipeline_mode<synchronous>, transform_indices = @transform_1, window_bounds = array<i64: 8, 4>}, {transform_indices = @transform_2, window_bounds = array<i64: 1, 8, 64>}]} {
    %c0 = arith.constant 0 : index
    %c0_0 = arith.constant 0 : index
    %0 = vector.load %arg2[%c0, %c0_0] : memref<8x4xf32, #tpu.memory_space<vmem>>, vector<8x4xf32>
    %c0_1 = arith.constant 0 : index
    %c0_2 = arith.constant 0 : index
    %c0_3 = arith.constant 0 : index
    %1 = vector.load %arg1[%c0_1, %c0_2, %c0_3] : memref<1x4x64xf32, #tpu.memory_space<vmem>>, vector<1x4x64xf32>
    %2 = vector.shape_cast %1 : vector<1x4x64xf32> to vector<4x64xf32>
    %cst = arith.constant dense<0.000000e+00> : vector<8x64xf32>
    %3 = tpu.matmul %0, %2, %cst {dimension_numbers = #tpu.dot_dimension_numbers<[1], [0], [0], [1], [0, 0, 1, 1], [], []>} : vector<8x4xf32>, vector<4x64xf32>, vector<8x64xf32> -> vector<8x64xf32>
    %c0_4 = arith.constant 0 : index
    %c0_5 = arith.constant 0 : index
    %c0_6 = arith.constant 0 : index
    %4 = vector.load %arg3[%c0_4, %c0_5, %c0_6] : memref<1x8x64xf32, #tpu.memory_space<vmem>>, vector<1x8x64xf32>
    %5 = vector.shape_cast %4 : vector<1x8x64xf32> to vector<8x64xf32>
    %6 = vector.shape_cast %3 : vector<8x64xf32> to vector<1x8x64xf32>
    tpu.vector_store %arg3[%c0_4, %c0_5, %c0_6], %6 {strides = array<i32>} : memref<1x8x64xf32, #tpu.memory_space<vmem>>, vector<1x8x64xf32>,
    return
  }
  func.func @transform_0(%arg0: i32) -> (i32, i32, i32) {
    %c0_i32 = arith.constant 0 : i32
    %c0_i32_0 = arith.constant 0 : i32
    %c0_i32_1 = arith.constant 0 : i32
    return %arg0, %c0_i32, %c0_i32_0 : i32, i32, i32
  }
  func.func @transform_1(%arg0: i32) -> (i32, i32) {
    %c0_i32 = arith.constant 0 : i32
    %c0_i32_0 = arith.constant 0 : i32
    %c0_i32_1 = arith.constant 0 : i32
    return %c0_i32, %c0_i32_0 : i32, i32
  }
  func.func @transform_2(%arg0: i32) -> (i32, i32, i32) {
    %c0_i32 = arith.constant 0 : i32
    %c0_i32_0 = arith.constant 0 : i32
    %c0_i32_1 = arith.constant 0 : i32
    return %arg0, %c0_i32, %c0_i32_0 : i32, i32, i32
  }
}

</mosaic_0001>

<bundles_post_ra>
// kernel: tpu_custom_call.1
= control target key start
LH: loop header
LB: loop body
LE: loop exit
PB: predicated region body
PF: predicated region fallthrough
CT: control target
= control target key end

     0   :  { %7 = vsyncpa [#allocation3], 0  ;;  %s539_s0 = inlined_call_operand.vmem [shape: f32[2,4,64], index: 0, kind: input, shape index: {}]   ;;  %s540_s1 = inlined_call_operand.vmem [shape: f32[8,4], index: 1, kind: input, shape index: {}]   ;;  %s541_s2 = inlined_call_operand.hbm [shape: f32[2,8,64], index: 2, kind: output, shape index: {}]  }
   0x1   :  { %9 = vsyncpa [#allocation3 + $0x1], 0  ;;  %s436_s9 = smov 0   ;;  %s438_s10 = smov 0  }
   0x2   :  { %s440_s11 = smov 0   ;;  %s442_s12 = smov 0  }
   0x3 LB: > { %s457_s13 = sadd.s32 4294967295, %s416_s12   ;;  %s294_s14 = sadd.s32 4294967294, %s416_s12   ;;  %s416_s12 = sphi %s442_s12, %s547_s12   ;;  %s412_s11 = sphi %s440_s11, %s546_s11   ;;  %s408_s10 = sphi %s438_s10, %s545_s10   ;;  %s404_s9 = sphi %s436_s9, %s544_s9  }
   0x4   : > { %s461_s15 = sadd.s32 1, %s416_s12   ;;  %s69_s16 = sadd.s32 1, %s412_s11 }
   0x5   : > { %s66_s17 = ssub.s32 %s416_s12, %s461_s15  ;;  %p79_p0 = scmp.ne.s32.totalorder %s412_s11, %s408_s10 }
   0x6   : > { %p67_p1 = scmp.eq.s32.totalorder %s66_s17, 0  ;;  %p80_p2 = scmp.eq.s32.totalorder %s457_s13, 1 }
   0x7   : > { %p85_p3 = scmp.ne.s32.totalorder %s408_s10, %s404_s9  ;;  %p86_p4 = scmp.eq.s32.totalorder %s294_s14, 1 }
   0x8   : > { %s472_s18 = scalar_select %p67_p1, %s412_s11, %s69_s16  }
   0x9   : > { %p474_p5 = por %p80_p2, %p79_p0  ;;  %p478_p6 = por %p86_p4, %p85_p3 }
   0xa   : > { %p297_p7 = scmp.ge.s32.totalorder %s416_s12, 1  ;;  %p114_p8 = scmp.lt.s32.totalorder %s416_s12, 3 }
   0xc   : > { %p115_p9 = pnand %p297_p7, %p114_p8 }
   0xd   : > { %p135_p10 = scmp.lt.s32.totalorder (!%p115_p9), %s457_s13, 1  ;;  %v418_v0 = vmov (!%p115_p9), 0.0   ;;  %vm419_vm0 = vmmov (!%p115_p9), 0   ;;  %vm145_vm1 = vcmask (!%p115_p9), 1043456   ;;  %v139_v1 = vld [vmem:[%s540_s1] sm:$0xff] (!%p115_p9)  ;;  %vm141_vm2 = vcmask (!%p115_p9), 31744  }
   0xe   : > { %118 = sbr.rel (%p115_p9) target bundleno = 253 (0xfd), region = 28  ;;  %308 = vmatprep.subr.mxu0 (!%p115_p9), %v418_v0  ;;  %310 = vmatprep.mubr.msk.f32.mxu0 (!%p115_p9), %vm419_vm0, %v418_v0  ;;  %s132_s28 = sand.u32 (!%p115_p9), 1, %s408_s10   ;;  %vm219_vm3 = vcmask (!%p115_p9), 523264  }
   0xf   : > { %s298_s29 = sshll.u32 (!%p115_p9), %s132_s28, 3  ;;  %s303_s30 = sshll.u32 (!%p115_p9), %s457_s13, 7 }
  0x10   : > { %s134_s3 = scalar_lea.vmem (!%p115_p9), [#allocation2], %s298_s29  ;;  %s497_s7 = scalar_lea.hbm (!%p115_p9), %s541_s2, %s303_s30 }
  0x11   : > { %s235_s4 = sshll.u32 (!%p115_p9), %s134_s3, 4  ;;  %s222_s8 = scalar_lea.sflag (!%p115_p9), [#allocation3], %s132_s28  ;;  %s499_s4 = int_to_ptr.vmem [resolvable:$true] %s235_s4 }
  0x12   : > { %s354_s14 = scalar_lea.vmem (!%p115_p9), %s499_s4, 128 }
  0x13   : > { %p355_p11 = scmp.ne.s32.totalorder (!%p115_p9), %s499_s4, %s354_s14 }
  0x15   : > { %s136_s21 = scalar_select %p135_p10, %s457_s13, 1 }
  0x16   : > { %p356_p12 = pnand %p355_p11, %p474_p5  ;;  %s420_s13 = smov [#allocation2]  }
  0x17   : > { %s299_s22 = sshll.u32 %s136_s21, 2  ;;  %s358_s16 = sshll.u32 %s420_s13, 4  ;;  %s359_s16 = int_to_ptr.vmem [resolvable:$false] %s358_s16 }
  0x18   : > { %s138_s25 = scalar_lea.vmem %s539_s0, %s299_s22  ;;  %p357_p13 = pneg %p356_p12 }
  0x19   : > { %v140_v2 = vld [vmem:[%s138_s25] sm:$0xf]  ;;  %s360_s17 = scalar_lea.vmem %s359_s16, 256  ;;  %p361_p0 = scmp.lt.s32.totalorder %s499_s4, %s359_s16 }
  0x1a   : > { %309 = vmatpush3.msk.msra.mxu0 %vm145_vm1, %v140_v2  ;;  %p362_p1 = scmp.lt.s32.totalorder %s360_s17, %s354_s14 }
  0x1b   : > { %311 = vmatmul.mubr.msk.f32.vlgmr.msra.gmra.mrb[0].mxu0 %vm141_vm2, %v139_v1 }
  0x1c   : > { %p363_p2 = por %p362_p1, %p361_p0 }
  0x1e   : > { %p364_p3 = pnand %p363_p2, %p357_p13 }
  0xee   : > { %v215_v3 = vpop.f32.mrb[0].mxu0 }
  0xef   : > { %220 = vst.msk [vmem:[%s134_s3] sm:$0xff] %vm219_vm3, %v215_v3  ;;  %v312_v4 = vpop.f32.mrb[1].mxu0 }
  0xf0   : > { %367 = shalt.err (!%p364_p3)
}
  0xf1   : > { %s368_s21 = scalar_lea.hbm %s497_s7, 128  ;;  %s372_s24 = scalar_lea.hbm %s541_s2, 256 }
  0xf2   : > { %p369_p4 = scmp.ne.s32.totalorder %s497_s7, %s368_s21  ;;  %p373_p9 = scmp.lt.u32.totalorder %s497_s7, %s541_s2 }
  0xf3   : > { %p374_p10 = scmp.lt.u32.totalorder %s372_s24, %s368_s21  ;;  %p376_p12 = scmp.lt.u32.totalorder %s368_s21, %s497_s7 }
  0xf4   : > { %p370_p7 = pnand %p369_p4, %p474_p5 }
  0xf5   : > { %p375_p11 = por %p374_p10, %p373_p9 }
  0xf6   : > { %p371_p8 = pneg %p370_p7 }
  0xf7   : > { %p377_p13 = por %p376_p12, %p375_p11 }
  0xf9   : > { %p378_p0 = pnand %p377_p13, %p371_p8 }
  0xfb   : > { %381 = shalt.err (!%p378_p0)
}
  0xfc   : > { %313 = dma.vmem_to_hbm [thread:$0]  (%p474_p5), %s499_s4, 128, %s497_s7, %s222_s8  }
  0xfd PF: > { %p319_p1 = scmp.ge.s32.totalorder %s416_s12, 2  ;;  %s247_s27 = sand.u32 1, %s404_s9  }
  0xfe   : > { %s248_s28 = scalar_lea.sflag [#allocation3], %s247_s27 }
  0xff   : > { %p316_p2 = pnand %p319_p1, %p478_p6 }
 0x101   : > { %399 = dma.done.wait (!%p316_p2), %s248_s28, 128  }
 0x102   : > { %401 = vsyncadd (!%p316_p2), %s248_s28, 4294967168  ;;  %p12_p3 = scmp.ge.s32.totalorder %s461_s15, 4   ;;  %s544_s9 = smov %s408_s10 }
 0x103   : > { %s545_s10 = smov %s412_s11  ;;  %s546_s11 = smov %s472_s18 }
 0x104   : > { %s547_s12 = smov %s461_s15  ;;  %14 = sbr.rel (!%p12_p3) target bundleno = 3 (0x3), region = 63 }
 0x10b   :  { %253 = vsyncpa [#allocation3], 1 }
 0x10c   :  { %255 = vsyncpa [#allocation3 + $0x1], 1 }

</bundles_post_ra>
